<compile_context>
chip_gen: v7x
topology: tpu7x:2x2x1
jax: 0.10.0
libtpu: 0.0.40
codegen_flags: <defaults>
</compile_context>

<pallas_src>
import jax
import jax.numpy as jnp
from jax.experimental import pallas as pl
from jax.experimental.pallas import tpu as pltpu

IN_FEATURES = 45
HIDDEN = 10
OUT_FEATURES = 1


def simplenet_kernel(x_ref, w1_ref, b1_ref, w2c_ref, b2_ref, o_ref):
    # x_ref:  (45, bm)  activations, batch on the lane axis
    # w1_ref: (10, 45)  layer-1 weight (PyTorch orientation)
    # b1_ref: (10, 1)   layer-1 bias (broadcast over lanes)
    # w2c_ref:(10, 1)   layer-2 weight column (== W2.T)
    # b2_ref: (1,)      layer-2 bias scalar in SMEM
    # o_ref:  (1, bm)   lane-dense output tile
    x = x_ref[...]
    # Layer 1 on the MXU with f32 accumulation: (10,45) @ (45,bm) -> (10,bm)
    h = jnp.dot(w1_ref[...], x, preferred_element_type=jnp.float32)
    h = h + b1_ref[...]
    h = jnp.maximum(h, 0.0)                                   # ReLU
    # Layer 2 on the VPU/XLU: weighted sum over the 10 hidden rows -> (1, bm)
    y = jnp.sum(w2c_ref[...] * h, axis=0, keepdims=True)
    y = y + b2_ref[0]                                         # SMEM scalar bias
    o_ref[...] = y.astype(o_ref.dtype)


def _pick_block_batch(Bp):
    """Byte-budget tile picker for the batch (lane) axis.

    Bp must be a multiple of 128 (callers pad).  Targets a large x tile:
    up to 16384 lanes (45*16384*4 ~ 2.8 MiB per buffer, ~5.6 MiB double-
    buffered) -- inside v5e's 16 MiB scoped-VMEM default and far inside
    v6e/v7x's 32 MiB -- since >=512-lane tiles run near the HBM roofline
    while 128-lane tiles reach only ~29% of it.  Prefers an even grid of
    >=2 steps so ("parallel",) semantics can use both v7x TensorCores.
    """
    MAX_BM = 16384            # VMEM-safe on v5e/v6e/v7x, ~2.8 MiB x tile
    MIN_BM = 512              # below this, tiles are overhead-dominated
    if Bp <= MIN_BM:
        return Bp             # tiny batch: single small tile
    bm = min(Bp, MAX_BM)
    bm -= bm % 128
    while Bp % bm != 0:       # largest 128-multiple divisor of Bp <= MAX_BM
        bm -= 128
    steps = Bp // bm
    if steps == 1 and Bp // 2 >= MIN_BM and (Bp // 2) % 128 == 0:
        bm = Bp // 2          # 2 even steps: keep both v7x TCs busy
    elif steps > 1 and steps % 2 == 1 and bm // 2 >= MIN_BM and bm % 256 == 0:
        bm //= 2              # make the grid even for the 2-TC split
    return bm


def simplenet_forward(x_fm, w1, b1, w2c, b2, *, block_batch=None):
    """Feature-major SimpleNet forward.

    x_fm : (45, B)  activations, batch on the lane axis (f32).
    w1   : (10, 45) layer-1 weight (PyTorch orientation).
    b1   : (10, 1)  layer-1 bias.
    w2c  : (10, 1)  layer-2 weight stored as a column (== W2.T).
    b2   : (1,)     layer-2 bias scalar.
    Returns (1, B) float32 (transpose of the PyTorch (B, 1) output).
    """
    F, B = x_fm.shape
    assert F == IN_FEATURES
    # Pad the batch axis to a lane multiple so every tile is lane-dense and
    # the VMEM footprint stays bounded regardless of B.
    Bp = ((B + 127) // 128) * 128
    if Bp != B:
        x_fm = jnp.pad(x_fm, ((0, 0), (0, Bp - B)))

    bm = _pick_block_batch(Bp) if block_batch is None else block_batch
    assert Bp % bm == 0 and (bm % 128 == 0 or bm == Bp), (Bp, bm)
    grid = (Bp // bm,)

    # NOTE: no wrapper-side dtype cast here -- for this HBM-bound kernel a
    # separate f32->bf16 pass would add traffic, not remove it.  If upstream
    # already emits bf16 activations, pass them through and cast w1 to match.
    out = pl.pallas_call(
        simplenet_kernel,
        out_shape=jax.ShapeDtypeStruct((OUT_FEATURES, Bp), jnp.float32),
        grid_spec=pltpu.PrefetchScalarGridSpec(
            num_scalar_prefetch=0,
            grid=grid,
            in_specs=[
                pl.BlockSpec((IN_FEATURES, bm), lambda i: (0, i)),       # x
                pl.BlockSpec((HIDDEN, IN_FEATURES), lambda i: (0, 0)),   # w1
                pl.BlockSpec((HIDDEN, 1), lambda i: (0, 0)),             # b1
                pl.BlockSpec((HIDDEN, OUT_FEATURES), lambda i: (0, 0)),  # w2 col
                pl.BlockSpec(memory_space=pltpu.MemorySpace.SMEM),       # b2
            ],
            out_specs=pl.BlockSpec((OUT_FEATURES, bm), lambda i: (0, i)),
        ),
        compiler_params=pltpu.CompilerParams(
            dimension_semantics=("parallel",)),
    )(x_fm, w1, b1, w2c, b2)

    return out[:, :B] if Bp != B else out


def init_params(key):
    # Deterministic init mimicking nn.Linear's uniform(-1/sqrt(fan_in), ...)
    k1, k2, k3, k4 = jax.random.split(key, 4)
    bound1 = 1.0 / (IN_FEATURES ** 0.5)
    bound2 = 1.0 / (HIDDEN ** 0.5)
    w1 = jax.random.uniform(k1, (HIDDEN, IN_FEATURES), jnp.float32,
                            -bound1, bound1)                  # PyTorch (out,in)
    b1 = jax.random.uniform(k2, (HIDDEN, 1), jnp.float32, -bound1, bound1)
    w2c = jax.random.uniform(k3, (HIDDEN, OUT_FEATURES), jnp.float32,
                             -bound2, bound2)                 # == W2.T
    b2 = jax.random.uniform(k4, (OUT_FEATURES,), jnp.float32, -bound2, bound2)
    return w1, b1, w2c, b2


if __name__ == "__main__":
    key = jax.random.PRNGKey(0)
    kx, kp = jax.random.split(key)
    batch = 8                         # small; exercises the pad-to-128 path
    # Feature-major activations: (45, B), batch on the 128-lane axis.
    x_fm = jax.random.normal(kx, (IN_FEATURES, batch), jnp.float32)
    w1, b1, w2c, b2 = init_params(kp)

    out = simplenet_forward(x_fm, w1, b1, w2c, b2)
    jax.block_until_ready(out)

    # Reference in plain JAX with the exact PyTorch-module math (row-major).
    x_rm = x_fm.T                                              # (B, 45)
    ref = jnp.maximum(x_rm @ w1.T + b1[:, 0], 0.0) @ w2c + b2  # (B, 1)
    assert out.shape == (OUT_FEATURES, batch)
    assert jnp.allclose(out, ref.T, atol=1e-5, rtol=1e-5)

    # Sanity-check the tile picker's byte-budget / even-grid behaviour.
    assert _pick_block_batch(1024) == 512          # 2 even steps (v7x 2-TC)
    assert _pick_block_batch(65536) == 16384       # 4 big tiles, VMEM-safe
    assert _pick_block_batch(128) == 128           # tiny batch, single tile

    print("KERNEL_OK")
</pallas_src>

<mosaic_0001>
module attributes {stable_mosaic.version = 11 : i64} {
  func.func @simplenet_kernel(%arg0: i32, %arg1: memref<45x128xf32, #tpu.memory_space<vmem>>, %arg2: memref<10x45xf32, #tpu.memory_space<vmem>>, %arg3: memref<10x1xf32, #tpu.memory_space<vmem>>, %arg4: memref<10x1xf32, #tpu.memory_space<vmem>>, %arg5: memref<1xf32, #tpu.memory_space<smem>>, %arg6: memref<1x128xf32, #tpu.memory_space<vmem>>) attributes {dimension_semantics = [#tpu.dimension_semantics<parallel>], iteration_bounds = array<i64: 1>, scalar_prefetch = 0 : i64, scratch_operands = 0 : i64, tpu.core_type = #tpu.core_type<tc>, window_params = [{transform_indices = @transform_0, window_bounds = array<i64: 45, 128>}, {pipeline_mode = #tpu.pipeline_mode<synchronous>, transform_indices = @transform_1, window_bounds = array<i64: 10, 45>}, {pipeline_mode = #tpu.pipeline_mode<synchronous>, transform_indices = @transform_2, window_bounds = array<i64: 10, 1>}, {pipeline_mode = #tpu.pipeline_mode<synchronous>, transform_indices = @transform_3, window_bounds = array<i64: 10, 1>}, {transform_indices = @transform_4, window_bounds = array<i64: 1>}, {transform_indices = @transform_5, window_bounds = array<i64: 1, 128>}]} {
    %c0 = arith.constant 0 : index
    %c0_0 = arith.constant 0 : index
    %0 = vector.load %arg1[%c0, %c0_0] : memref<45x128xf32, #tpu.memory_space<vmem>>, vector<45x128xf32>
    %c0_1 = arith.constant 0 : index
    %c0_2 = arith.constant 0 : index
    %1 = vector.load %arg2[%c0_1, %c0_2] : memref<10x45xf32, #tpu.memory_space<vmem>>, vector<10x45xf32>
    %cst = arith.constant dense<0.000000e+00> : vector<10x128xf32>
    %2 = tpu.matmul %1, %0, %cst {dimension_numbers = #tpu.dot_dimension_numbers<[1], [0], [0], [1], [0, 0, 1, 1], [], []>} : vector<10x45xf32>, vector<45x128xf32>, vector<10x128xf32> -> vector<10x128xf32>
    %c0_3 = arith.constant 0 : index
    %c0_4 = arith.constant 0 : index
    %3 = vector.load %arg3[%c0_3, %c0_4] : memref<10x1xf32, #tpu.memory_space<vmem>>, vector<10x1xf32>
    %4 = vector.broadcast %3 : vector<10x1xf32> to vector<10x128xf32>
    %5 = arith.addf %2, %4 : vector<10x128xf32>
    %cst_5 = arith.constant 0.000000e+00 : f32
    %6 = vector.broadcast %cst_5 : f32 to vector<10x128xf32>
    %7 = arith.maximumf %5, %6 : vector<10x128xf32>
    %c0_6 = arith.constant 0 : index
    %c0_7 = arith.constant 0 : index
    %8 = vector.load %arg4[%c0_6, %c0_7] : memref<10x1xf32, #tpu.memory_space<vmem>>, vector<10x1xf32>
    %9 = vector.broadcast %8 : vector<10x1xf32> to vector<10x128xf32>
    %10 = arith.mulf %9, %7 : vector<10x128xf32>
    %cst_8 = arith.constant dense<0.000000e+00> : vector<128xf32>
    %11 = vector.multi_reduction <add>, %10, %cst_8 [0] : vector<10x128xf32> to vector<128xf32>
    %12 = vector.shape_cast %11 : vector<128xf32> to vector<1x128xf32>
    %c0_9 = arith.constant 0 : index
    %13 = memref.load %arg5[%c0_9] : memref<1xf32, #tpu.memory_space<smem>>
    %14 = vector.broadcast %13 : f32 to vector<1x128xf32>
    %15 = arith.addf %12, %14 : vector<1x128xf32>
    %c0_10 = arith.constant 0 : index
    %c0_11 = arith.constant 0 : index
    %16 = vector.load %arg6[%c0_10, %c0_11] : memref<1x128xf32, #tpu.memory_space<vmem>>, vector<1x128xf32>
    tpu.vector_store %arg6[%c0_10, %c0_11], %15 {strides = array<i32>} : memref<1x128xf32, #tpu.memory_space<vmem>>, vector<1x128xf32>,
    return
  }
  func.func @transform_0(%arg0: i32) -> (i32, i32) {
    %c0_i32 = arith.constant 0 : i32
    %c0_i32_0 = arith.constant 0 : i32
    return %c0_i32, %arg0 : i32, i32
  }
  func.func @transform_1(%arg0: i32) -> (i32, i32) {
    %c0_i32 = arith.constant 0 : i32
    %c0_i32_0 = arith.constant 0 : i32
    %c0_i32_1 = arith.constant 0 : i32
    return %c0_i32, %c0_i32_0 : i32, i32
  }
  func.func @transform_2(%arg0: i32) -> (i32, i32) {
    %c0_i32 = arith.constant 0 : i32
    %c0_i32_0 = arith.constant 0 : i32
    %c0_i32_1 = arith.constant 0 : i32
    return %c0_i32, %c0_i32_0 : i32, i32
  }
  func.func @transform_3(%arg0: i32) -> (i32, i32) {
    %c0_i32 = arith.constant 0 : i32
    %c0_i32_0 = arith.constant 0 : i32
    %c0_i32_1 = arith.constant 0 : i32
    return %c0_i32, %c0_i32_0 : i32, i32
  }
  func.func @transform_4(%arg0: i32) -> i32 {
    %c0_i32 = arith.constant 0 : i32
    %c0_i32_0 = arith.constant 0 : i32
    return %c0_i32 : i32
  }
  func.func @transform_5(%arg0: i32) -> (i32, i32) {
    %c0_i32 = arith.constant 0 : i32
    %c0_i32_0 = arith.constant 0 : i32
    return %c0_i32, %arg0 : i32, i32
  }
}

</mosaic_0001>

<bundles_post_ra>
// kernel: tpu_custom_call.1
= control target key start
LH: loop header
LB: loop body
LE: loop exit
PB: predicated region body
PF: predicated region fallthrough
CT: control target
= control target key end

     0   :  { %11 = vsyncpa [#allocation4], 0  ;;  %s365_s0 = inlined_call_operand.hbm [shape: f32[45,128], index: 0, kind: input, shape index: {}]   ;;  %s366_s1 = inlined_call_operand.vmem [shape: f32[10,45], index: 1, kind: input, shape index: {}]   ;;  %s367_s2 = inlined_call_operand.vmem [shape: f32[10,1], index: 2, kind: input, shape index: {}]   ;;  %s368_s3 = inlined_call_operand.vmem [shape: f32[10,1], index: 3, kind: input, shape index: {}]   ;;  %s369_s4 = inlined_call_operand.<no memory space> [shape: f32[1], index: 4, kind: input, shape index: {}]   ;;  %s370_s5 = inlined_call_operand.hbm [shape: f32[1,128], index: 5, kind: output, shape index: {}]  }
   0x1   :  { %12 = vsyncpa [#allocation5], 0  ;;  %s282_s18 = smov [#allocation3]   ;;  %s234_s22 = scalar_lea.hbm %s365_s0, 768 }
   0x2   :  { %s18_s19 = sshll.u32 %s282_s18, 4  ;;  %p235_p0 = scmp.ne.s32.totalorder %s365_s0, %s234_s22  ;;  %s19_s19 = int_to_ptr.vmem [resolvable:$true] %s18_s19 }
   0x3   :  { %p238_p1 = scmp.lt.u32.totalorder %s234_s22, %s365_s0 }
   0x5   :  { %p240_p2 = pnand %p238_p1, %p235_p0 }
   0x7   :  { %243 = shalt.err (!%p240_p2)
}
   0x8   :  { %s244_s27 = scalar_lea.vmem %s19_s19, 768  ;;  %p249_p4 = scmp.lt.s32.totalorder %s19_s19, %s19_s19 }
   0x9   :  { %p245_p3 = scmp.ne.s32.totalorder %s19_s19, %s244_s27  ;;  %p250_p5 = scmp.lt.s32.totalorder %s244_s27, %s244_s27 }
   0xb   :  { %p251_p6 = por %p250_p5, %p249_p4 }
   0xd   :  { %p252_p7 = pnand %p251_p6, %p245_p3 }
   0xf   :  { %255 = shalt.err (!%p252_p7)
}
  0x10   :  { %s283_s28 = smov 128   ;;  %s284_s29 = smov 8  }
  0x11   :  { %24 = dma.hbm_to_vmem [thread:$0]  %s365_s0, 768, %s19_s19, [#allocation4], %s283_s28, %s283_s28, %s284_s29  }
  0x12   :  { %278 = dma.done.wait [#allocation4], 768  }
  0x13   :  { %279 = vsyncadd [#allocation4], 4294966528  ;;  %v285_v0 = vmov 0   ;;  %v36_v1 = vld [vmem:[#allocation3] sm:$0xff]  ;;  %v37_v2 = vld [vmem:[#allocation3 + $0x8] sm:$0xff]  ;;  %vm56_vm0 = vcmask 367616   ;;  %v168_v35 = vstv %s369_s4 }
  0x14   :  { %232 = vset.pattern.permute.xlu0 %v285_v0  ;;  %233 = vset.pattern.permute.xlu1 %v285_v0  ;;  %v38_v3 = vld [vmem:[#allocation3 + $0x10] sm:$0xff]  ;;  %v212_v4 = vpack.c.bf16 %v37_v2, %v36_v1  ;;  %v39_v5 = vld [vmem:[#allocation3 + $0x18] sm:$0xff]  ;;  %v40_v6 = vld [vmem:[#allocation3 + $0x20] sm:$0xff]  ;;  %vm63_vm1 = vcmask 1044480   ;;  %vm286_vm2 = vmmov 1   ;;  %vm158_vm4 = vcmask 1041408  }
  0x15   :  { %v216_v7 = vpack.c.bf16 %v39_v5, %v38_v3  ;;  %v41_v8 = vld [vmem:[#allocation3 + $0x28] sm:$0x1f]  ;;  %v42_v9 = vld [vmem:[%s366_s1] sm:$0xff]  ;;  %vm221_vm3 = vmpackc.low %vm63_vm1, %vm286_vm2 }
  0x16   :  { %v45_v10 = vld [vmem:[%s367_s2 + $0x8] sm:$0x3]  ;;  %213 = vmatprep.subr.bf16.mxu0 %v212_v4  ;;  %209 = vmatprep.mubr.msk.f32.mxu0 %vm56_vm0, %v42_v9  ;;  %v220_v12 = vpack.c.bf16 %v41_v8, %v40_v6  ;;  %v44_v13 = vld [vmem:[%s367_s2] sm:$0xff] }
  0x17   :  { %v145_v11 = vld [vmem:[%s368_s3 + $0x8] sm:$0x3]  ;;  %215 = vmatpush3.bf16.msra.mxu0 %v212_v4  ;;  %53 = vperm.xlu0 %232, %v45_v10   ;;  %v144_v14 = vld [vmem:[%s368_s3] sm:$0xff]  ;;  %s287_s3 = smov [#allocation6]  }
  0x18   :  { %217 = vmatprep.subr.bf16.mxu0 %v216_v7  ;;  %153 = vperm.xlu1 %233, %v145_v11   ;;  %v43_v15 = vld [vmem:[%s366_s1 + $0x8] sm:$0x3]  ;;  %s177_s18 = sshll.u32 %s287_s3, 4  ;;  %s178_s18 = int_to_ptr.vmem [resolvable:$true] %s177_s18 }
  0x19   :  { %s256_s19 = scalar_lea.vmem %s178_s18, 16  ;;  %s260_s20 = scalar_lea.vmem %s178_s18, 32 }
  0x1a   :  { %p257_p8 = scmp.ne.s32.totalorder %s178_s18, %s256_s19  ;;  %p261_p9 = scmp.lt.s32.totalorder %s178_s18, %s178_s18 }
  0x1b   :  { %219 = vmatpush3.bf16.msra.mxu0 %v216_v7  ;;  %48 = vperm.xlu0 %232, %v44_v13   ;;  %p262_p10 = scmp.lt.s32.totalorder %s260_s20, %s256_s19 }
  0x1c   :  { %222 = vmatprep.subr.msk.bf16.mxu0 %vm221_vm3, %v220_v12  ;;  %148 = vperm.xlu1 %233, %v144_v14  }
  0x1d   :  { %p263_p11 = por %p262_p10, %p261_p9 }
  0x1f   :  { %225 = vmatpush3.bf16.msk.msra.mxu0 %vm221_vm3, %v220_v12  ;;  %p264_p12 = pnand %p263_p11, %p257_p8 }
  0x22   :  { %210 = vmatmul.mubr.msk.f32.vlgmr.msra.gmra.mrb[0].mxu0 %vm56_vm0, %v43_v15 }
  0x96   :  { %v54_v16 = vpop.permute.xlu0 %53 }
  0x97   :  { %v154_v17 = vpop.permute.xlu1 %153 }
  0x9a   :  { %v49_v19 = vpop.permute.xlu0 %48 }
  0x9b   :  { %v149_v26 = vpop.permute.xlu1 %148 }
  0xf5   :  { %v211_v18 = vpop.f32.mrb[0].mxu0 }
  0xf6   :  { %v139_v20 = vadd.f32 %v211_v18, %v54_v16  ;;  %v133_v21 = vpop.f32.mrb[1].mxu0 }
  0xf7   :  { %v134_v22 = vadd.f32 %v133_v21, %v49_v19 }
  0xf8   :  { %v143_v23 = vmax.f32 %v139_v20, 0.0 }
  0xf9   :  { %v142_v24 = vmax.f32 %v134_v22, 0.0 }
  0xfa   :  { %v157_v25 = vmul.f32 %v154_v17, %v143_v23 }
  0xfb   :  { %v156_v27 = vmul.f32 %v149_v26, %v142_v24 }
  0xfc   :  { %v159_v28 = vsel %vm158_vm4, %v157_v25, 0.0 }
  0xfd   :  { %v160_v29 = vadd.f32 %v159_v28, %v156_v27 }
  0xff   :  { %v161_v30 = vrot.slane %v160_v29, 4 }
 0x101   :  { %v162_v31 = vadd.f32 %v161_v30, %v160_v29 }
 0x103   :  { %v163_v32 = vrot.slane %v162_v31, 2 }
 0x105   :  { %v164_v33 = vadd.f32 %v163_v32, %v162_v31 }
 0x107   :  { %v165_v34 = vrot.slane %v164_v33, 1 }
 0x109   :  { %v166_v36 = vadd.f32 %v165_v34, %v164_v33 }
 0x10b   :  { %v169_v37 = vadd.f32 %v168_v35, %v166_v36 }
 0x10d   :  { %170 = vst [vmem:[#allocation6] sm:$0x1] %v169_v37 }
 0x10e   :  { %267 = shalt.err (!%p264_p12)
}
 0x10f   :  { %s268_s23 = scalar_lea.hbm %s370_s5, 16 }
 0x110   :  { %p269_p13 = scmp.ne.s32.totalorder %s370_s5, %s268_s23  ;;  %p272_p0 = scmp.lt.u32.totalorder %s268_s23, %s370_s5 }
 0x112   :  { %p274_p1 = pnand %p272_p0, %p269_p13 }
 0x114   :  { %277 = shalt.err (!%p274_p1)
}
 0x115   :  { %180 = dma.vmem_to_hbm [thread:$0]  %s178_s18, 16, %s370_s5, [#allocation5]  }
 0x116   :  { %280 = dma.done.wait [#allocation5], 16  }
 0x117   :  { %281 = vsyncadd [#allocation5], 4294967280 }
 0x118   :  { %184 = vsyncpa [#allocation4], 1 }
 0x119   :  { %185 = vsyncpa [#allocation5], 1 }

</bundles_post_ra>
